<compile_context>
chip_gen: v6e
topology: v6e:2x2x1
jax: 0.10.0
libtpu: 0.0.40
codegen_flags: <defaults>
</compile_context>

<pallas_src>
import functools

import jax
import jax.numpy as jnp
from jax.experimental import pallas as pl
from jax.experimental.pallas import tpu as pltpu

STATE_SPACE_LENGTH = 64
ACTION_SPACE_LENGTH = 65
NEG_SLOPE = 0.01          # F.leaky_relu default
HEAD_PAD = 128            # fused head width: [A(65) | V(1) | zeros(62)]


def _leaky_relu(x):
    return jnp.where(x > 0, x, NEG_SLOPE * x)


def _round_up(n, m):
    return ((n + m - 1) // m) * m


def _cdiv(a, b):
    return (a + b - 1) // b


def qnet_kernel(x_ref, w1_ref, b1_ref, w2_ref, b2_ref, w3_ref, b3_ref,
                wh_ref, bh_ref, out_ref, psum_ref, *, batch, mxu_dtype):
    """One batch tile: x (TB, 64) f32 -> head (TB, 128) = [A | V | 0-pad],
    plus a row/column-masked partial sum of A for the global dueling mean."""
    x = x_ref[...].astype(mxu_dtype)                      # f32 load, cast on VPU

    h = jnp.dot(x, w1_ref[...], preferred_element_type=jnp.float32) + b1_ref[...]
    h = _leaky_relu(h)                                    # f32 elementwise

    h = jnp.dot(h.astype(w2_ref.dtype), w2_ref[...],
                preferred_element_type=jnp.float32) + b2_ref[...]
    h = _leaky_relu(h)

    h = jnp.dot(h.astype(w3_ref.dtype), w3_ref[...],
                preferred_element_type=jnp.float32) + b3_ref[...]
    h = _leaky_relu(h)

    head = jnp.dot(h.astype(wh_ref.dtype), wh_ref[...],      # fused A|V head
                   preferred_element_type=jnp.float32) + bh_ref[...]

    out_ref[...] = head.astype(out_ref.dtype)             # lane-dense store

    # Masked partial sum of the advantage columns (valid batch rows, cols<65).
    # Rides the XLU/VPU slots; removes the wrapper's extra mean pass.
    tb = head.shape[0]
    row = jax.lax.broadcasted_iota(jnp.int32, head.shape, 0) + pl.program_id(0) * tb
    col = jax.lax.broadcasted_iota(jnp.int32, head.shape, 1)
    valid = (row < batch) & (col < ACTION_SPACE_LENGTH)
    tile_sum = jnp.sum(jnp.where(valid, head, 0.0))
    psum_ref[...] = jnp.full(psum_ref.shape, tile_sum, dtype=jnp.float32)


def pack_params(params, mxu_dtype):
    """Fuse the A/V heads into one lane-dense (128, 128) matmul and cast the
    MXU operands.  Layer-1 weights stay (64, 128): no padded K."""
    wh = jnp.zeros((128, HEAD_PAD), jnp.float32)
    wh = wh.at[:, :ACTION_SPACE_LENGTH].set(params["wa"])
    wh = wh.at[:, ACTION_SPACE_LENGTH:ACTION_SPACE_LENGTH + 1].set(params["wv"])

    bh = jnp.zeros((1, HEAD_PAD), jnp.float32)
    bh = bh.at[:, :ACTION_SPACE_LENGTH].set(params["ba"])
    bh = bh.at[:, ACTION_SPACE_LENGTH:ACTION_SPACE_LENGTH + 1].set(params["bv"])

    cast = lambda w: w.astype(mxu_dtype)
    # Biases stay f32: bias add + leaky_relu run in f32 on the VPU.
    return (cast(params["w1"]), params["b1"],
            cast(params["w2"]), params["b2"],
            cast(params["w3"]), params["b3"],
            cast(wh), bh)


def qnet_forward(x, params, *, mxu_dtype=jnp.bfloat16, block_b=1024):
    """x: (B, 64) f32.  Returns (B, 65) f32 with QNet.forward semantics."""
    B = x.shape[0]
    packed = pack_params(params, mxu_dtype)
    f32_path = jnp.dtype(mxu_dtype) == jnp.dtype(jnp.float32)
    out_dtype = jnp.float32 if f32_path else jnp.bfloat16

    # Pad the batch only up to a multiple of 8 sublanes (tiny / often a no-op).
    # The last grid block may be partial; Pallas masks its out-of-bounds rows,
    # so no tile-rounded copy of x is materialized.
    bp = _round_up(max(B, 1), 8)
    xp = x if bp == B else jnp.pad(x, ((0, bp - B), (0, 0)))

    # Batch tile: large (per-grid-step overhead ~0.35 us), multiple of 8, never
    # larger than the array.  If one tile would cover a big batch, split in two
    # so both v7x TensorCores get work ("parallel" batch axis).
    tb = min(_round_up(block_b, 8), bp)
    if bp >= 1024 and tb >= bp:
        tb = _round_up(_cdiv(bp, 2), 8)
    nb = _cdiv(bp, tb)

    x_spec = pl.BlockSpec((tb, STATE_SPACE_LENGTH), lambda i: (i, 0))
    const_specs = [pl.BlockSpec(p.shape, lambda i: (0, 0)) for p in packed]
    head_spec = pl.BlockSpec((tb, HEAD_PAD), lambda i: (i, 0))
    psum_spec = pl.BlockSpec((8, 128), lambda i: (i, 0))

    flops = 2 * bp * (STATE_SPACE_LENGTH * 128 + 128 * 256 + 256 * 128
                      + 128 * HEAD_PAD)
    bytes_accessed = (int(xp.size) * xp.dtype.itemsize
                      + sum(int(p.size) * p.dtype.itemsize for p in packed)
                      + bp * HEAD_PAD * jnp.dtype(out_dtype).itemsize
                      + nb * 8 * 128 * 4)

    kernel = functools.partial(qnet_kernel, batch=B, mxu_dtype=mxu_dtype)
    head, psum = pl.pallas_call(
        kernel,
        out_shape=(jax.ShapeDtypeStruct((bp, HEAD_PAD), out_dtype),
                   jax.ShapeDtypeStruct((nb * 8, 128), jnp.float32)),
        grid=(nb,),
        in_specs=[x_spec] + const_specs,
        out_specs=(head_spec, psum_spec),
        compiler_params=pltpu.CompilerParams(
            dimension_semantics=("parallel",),
            vmem_limit_bytes=32 * 1024 * 1024),
        cost_estimate=pl.CostEstimate(flops=int(flops), transcendentals=0,
                                      bytes_accessed=int(bytes_accessed)),
    )(xp, *packed)

    # Dueling combine with the GLOBAL scalar mean (torch A.mean(), no dim): it
    # couples every batch tile, so it is finished here from the tiny in-kernel
    # partial sums; one fused elementwise pass over the 65 useful columns.
    a = head[:B, :ACTION_SPACE_LENGTH].astype(jnp.float32)
    v = head[:B, ACTION_SPACE_LENGTH:ACTION_SPACE_LENGTH + 1].astype(jnp.float32)
    mean_a = jnp.sum(psum[::8, 0]) / (B * ACTION_SPACE_LENGTH)
    return v + a - mean_a


def init_params(key):
    """Deterministic synthetic init (uniform, Linear-style fan_in scaling)."""
    dims = [
        ("w1", "b1", STATE_SPACE_LENGTH, 128),
        ("w2", "b2", 128, 256),
        ("w3", "b3", 256, 128),
        ("wa", "ba", 128, ACTION_SPACE_LENGTH),
        ("wv", "bv", 128, 1),
    ]
    params = {}
    for wname, bname, fan_in, fan_out in dims:
        key, kw, kb = jax.random.split(key, 3)
        bound = 1.0 / (fan_in ** 0.5)
        params[wname] = jax.random.uniform(
            kw, (fan_in, fan_out), jnp.float32, -bound, bound)
        params[bname] = jax.random.uniform(
            kb, (1, fan_out), jnp.float32, -bound, bound)
    return params


def qnet_reference(x, params, mxu_dtype=jnp.float32, head_store_dtype=None):
    """Plain-JAX reference.  Optionally mirrors the kernel's bf16 MXU operands
    and bf16 head store (the dueling mean is taken BEFORE the store rounding,
    exactly like the kernel's f32 partial sums)."""
    def dense(h, w, b):
        return jnp.dot(h.astype(mxu_dtype), w.astype(mxu_dtype),
                       preferred_element_type=jnp.float32) + b
    h = _leaky_relu(dense(x, params["w1"], params["b1"]))
    h = _leaky_relu(dense(h, params["w2"], params["b2"]))
    h = _leaky_relu(dense(h, params["w3"], params["b3"]))
    a = dense(h, params["wa"], params["ba"])
    v = dense(h, params["wv"], params["bv"])
    mean_a = jnp.mean(a)
    if head_store_dtype is not None:
        a = a.astype(head_store_dtype).astype(jnp.float32)
        v = v.astype(head_store_dtype).astype(jnp.float32)
    return v + a - mean_a


if __name__ == "__main__":
    key = jax.random.PRNGKey(0)
    key, kx = jax.random.split(key)
    params = init_params(key)

    # Small batch (B=2, padded to 8 sublanes): f32 parity path and bf16 path.
    B = 2
    x = jax.random.normal(kx, (B, STATE_SPACE_LENGTH), jnp.float32)

    out_f32 = jax.block_until_ready(qnet_forward(x, params, mxu_dtype=jnp.float32))
    ref_f32 = qnet_reference(x, params, mxu_dtype=jnp.float32)
    assert out_f32.shape == (B, ACTION_SPACE_LENGTH), out_f32.shape
    assert jnp.allclose(out_f32, ref_f32, atol=1e-4, rtol=1e-4), "f32 mismatch"

    out_bf16 = jax.block_until_ready(qnet_forward(x, params))  # bf16 MXU + bf16 store
    ref_bf16 = qnet_reference(x, params, mxu_dtype=jnp.bfloat16,
                              head_store_dtype=jnp.bfloat16)
    assert out_bf16.shape == (B, ACTION_SPACE_LENGTH), out_bf16.shape
    assert jnp.allclose(out_bf16, ref_bf16, atol=1e-3, rtol=1e-3), "bf16 mismatch"

    # Multi-tile path: batch not a multiple of 8, several grid steps, padded
    # rows masked out of the global advantage mean.
    B2 = 20
    key, kx2 = jax.random.split(key)
    x2 = jax.random.normal(kx2, (B2, STATE_SPACE_LENGTH), jnp.float32)
    out2 = jax.block_until_ready(qnet_forward(x2, params, block_b=8))
    ref2 = qnet_reference(x2, params, mxu_dtype=jnp.bfloat16,
                          head_store_dtype=jnp.bfloat16)
    assert out2.shape == (B2, ACTION_SPACE_LENGTH), out2.shape
    assert jnp.allclose(out2, ref2, atol=1e-3, rtol=1e-3), "multi-tile mismatch"

    # Partial final block: B multiple of 8 but not of the tile -> Pallas masks
    # the out-of-bounds rows of the last block (no wrapper row padding).
    B3 = 48
    key, kx3 = jax.random.split(key)
    x3 = jax.random.normal(kx3, (B3, STATE_SPACE_LENGTH), jnp.float32)
    out3 = jax.block_until_ready(qnet_forward(x3, params, block_b=32))
    ref3 = qnet_reference(x3, params, mxu_dtype=jnp.bfloat16,
                          head_store_dtype=jnp.bfloat16)
    assert out3.shape == (B3, ACTION_SPACE_LENGTH), out3.shape
    assert jnp.allclose(out3, ref3, atol=1e-3, rtol=1e-3), "partial-block mismatch"

    print("KERNEL_OK")
</pallas_src>

<mosaic_0001>
module attributes {stable_mosaic.version = 11 : i64} {
  func.func @qnet_kernel(%arg0: i32, %arg1: memref<8x64xf32, #tpu.memory_space<vmem>>, %arg2: memref<64x128xf32, #tpu.memory_space<vmem>>, %arg3: memref<1x128xf32, #tpu.memory_space<vmem>>, %arg4: memref<128x256xf32, #tpu.memory_space<vmem>>, %arg5: memref<1x256xf32, #tpu.memory_space<vmem>>, %arg6: memref<256x128xf32, #tpu.memory_space<vmem>>, %arg7: memref<1x128xf32, #tpu.memory_space<vmem>>, %arg8: memref<128x128xf32, #tpu.memory_space<vmem>>, %arg9: memref<1x128xf32, #tpu.memory_space<vmem>>, %arg10: memref<8x128xf32, #tpu.memory_space<vmem>>, %arg11: memref<8x128xf32, #tpu.memory_space<vmem>>) attributes {dimension_semantics = [#tpu.dimension_semantics<parallel>], iteration_bounds = array<i64: 1>, scalar_prefetch = 0 : i64, scratch_operands = 0 : i64, tpu.core_type = #tpu.core_type<tc>, window_params = [{transform_indices = @transform_0, window_bounds = array<i64: 8, 64>}, {pipeline_mode = #tpu.pipeline_mode<synchronous>, transform_indices = @transform_1, window_bounds = array<i64: 64, 128>}, {pipeline_mode = #tpu.pipeline_mode<synchronous>, transform_indices = @transform_2, window_bounds = array<i64: 1, 128>}, {pipeline_mode = #tpu.pipeline_mode<synchronous>, transform_indices = @transform_3, window_bounds = array<i64: 128, 256>}, {pipeline_mode = #tpu.pipeline_mode<synchronous>, transform_indices = @transform_4, window_bounds = array<i64: 1, 256>}, {pipeline_mode = #tpu.pipeline_mode<synchronous>, transform_indices = @transform_5, window_bounds = array<i64: 256, 128>}, {pipeline_mode = #tpu.pipeline_mode<synchronous>, transform_indices = @transform_6, window_bounds = array<i64: 1, 128>}, {pipeline_mode = #tpu.pipeline_mode<synchronous>, transform_indices = @transform_7, window_bounds = array<i64: 128, 128>}, {pipeline_mode = #tpu.pipeline_mode<synchronous>, transform_indices = @transform_8, window_bounds = array<i64: 1, 128>}, {transform_indices = @transform_9, window_bounds = array<i64: 8, 128>}, {transform_indices = @transform_10, window_bounds = array<i64: 8, 128>}]} {
    %c0 = arith.constant 0 : index
    %c0_0 = arith.constant 0 : index
    %0 = vector.load %arg1[%c0, %c0_0] : memref<8x64xf32, #tpu.memory_space<vmem>>, vector<8x64xf32>
    %c0_1 = arith.constant 0 : index
    %c0_2 = arith.constant 0 : index
    %1 = vector.load %arg2[%c0_1, %c0_2] : memref<64x128xf32, #tpu.memory_space<vmem>>, vector<64x128xf32>
    %cst = arith.constant dense<0.000000e+00> : vector<8x128xf32>
    %2 = tpu.matmul %0, %1, %cst {dimension_numbers = #tpu.dot_dimension_numbers<[1], [0], [0], [1], [0, 0, 1, 1], [], []>} : vector<8x64xf32>, vector<64x128xf32>, vector<8x128xf32> -> vector<8x128xf32>
    %c0_3 = arith.constant 0 : index
    %c0_4 = arith.constant 0 : index
    %3 = vector.load %arg3[%c0_3, %c0_4] : memref<1x128xf32, #tpu.memory_space<vmem>>, vector<1x128xf32>
    %4 = vector.broadcast %3 : vector<1x128xf32> to vector<8x128xf32>
    %5 = arith.addf %2, %4 : vector<8x128xf32>
    %cst_5 = arith.constant 0.000000e+00 : f32
    %6 = vector.broadcast %cst_5 : f32 to vector<8x128xf32>
    %7 = arith.cmpf ogt, %5, %6 : vector<8x128xf32>
    %cst_6 = arith.constant 0.00999999977 : f32
    %8 = vector.broadcast %cst_6 : f32 to vector<8x128xf32>
    %9 = arith.mulf %8, %5 : vector<8x128xf32>
    %10 = arith.select %7, %5, %9 : vector<8x128xi1>, vector<8x128xf32>
    %c0_7 = arith.constant 0 : index
    %c0_8 = arith.constant 0 : index
    %11 = vector.load %arg4[%c0_7, %c0_8] : memref<128x256xf32, #tpu.memory_space<vmem>>, vector<128x256xf32>
    %cst_9 = arith.constant dense<0.000000e+00> : vector<8x256xf32>
    %12 = tpu.matmul %10, %11, %cst_9 {dimension_numbers = #tpu.dot_dimension_numbers<[1], [0], [0], [1], [0, 0, 1, 1], [], []>} : vector<8x128xf32>, vector<128x256xf32>, vector<8x256xf32> -> vector<8x256xf32>
    %c0_10 = arith.constant 0 : index
    %c0_11 = arith.constant 0 : index
    %13 = vector.load %arg5[%c0_10, %c0_11] : memref<1x256xf32, #tpu.memory_space<vmem>>, vector<1x256xf32>
    %14 = vector.broadcast %13 : vector<1x256xf32> to vector<8x256xf32>
    %15 = arith.addf %12, %14 : vector<8x256xf32>
    %cst_12 = arith.constant 0.000000e+00 : f32
    %16 = vector.broadcast %cst_12 : f32 to vector<8x256xf32>
    %17 = arith.cmpf ogt, %15, %16 : vector<8x256xf32>
    %cst_13 = arith.constant 0.00999999977 : f32
    %18 = vector.broadcast %cst_13 : f32 to vector<8x256xf32>
    %19 = arith.mulf %18, %15 : vector<8x256xf32>
    %20 = arith.select %17, %15, %19 : vector<8x256xi1>, vector<8x256xf32>
    %c0_14 = arith.constant 0 : index
    %c0_15 = arith.constant 0 : index
    %21 = vector.load %arg6[%c0_14, %c0_15] : memref<256x128xf32, #tpu.memory_space<vmem>>, vector<256x128xf32>
    %cst_16 = arith.constant dense<0.000000e+00> : vector<8x128xf32>
    %22 = tpu.matmul %20, %21, %cst_16 {dimension_numbers = #tpu.dot_dimension_numbers<[1], [0], [0], [1], [0, 0, 1, 1], [], []>} : vector<8x256xf32>, vector<256x128xf32>, vector<8x128xf32> -> vector<8x128xf32>
    %c0_17 = arith.constant 0 : index
    %c0_18 = arith.constant 0 : index
    %23 = vector.load %arg7[%c0_17, %c0_18] : memref<1x128xf32, #tpu.memory_space<vmem>>, vector<1x128xf32>
    %24 = vector.broadcast %23 : vector<1x128xf32> to vector<8x128xf32>
    %25 = arith.addf %22, %24 : vector<8x128xf32>
    %cst_19 = arith.constant 0.000000e+00 : f32
    %26 = vector.broadcast %cst_19 : f32 to vector<8x128xf32>
    %27 = arith.cmpf ogt, %25, %26 : vector<8x128xf32>
    %cst_20 = arith.constant 0.00999999977 : f32
    %28 = vector.broadcast %cst_20 : f32 to vector<8x128xf32>
    %29 = arith.mulf %28, %25 : vector<8x128xf32>
    %30 = arith.select %27, %25, %29 : vector<8x128xi1>, vector<8x128xf32>
    %c0_21 = arith.constant 0 : index
    %c0_22 = arith.constant 0 : index
    %31 = vector.load %arg8[%c0_21, %c0_22] : memref<128x128xf32, #tpu.memory_space<vmem>>, vector<128x128xf32>
    %cst_23 = arith.constant dense<0.000000e+00> : vector<8x128xf32>
    %32 = tpu.matmul %30, %31, %cst_23 {dimension_numbers = #tpu.dot_dimension_numbers<[1], [0], [0], [1], [0, 0, 1, 1], [], []>} : vector<8x128xf32>, vector<128x128xf32>, vector<8x128xf32> -> vector<8x128xf32>
    %c0_24 = arith.constant 0 : index
    %c0_25 = arith.constant 0 : index
    %33 = vector.load %arg9[%c0_24, %c0_25] : memref<1x128xf32, #tpu.memory_space<vmem>>, vector<1x128xf32>
    %34 = vector.broadcast %33 : vector<1x128xf32> to vector<8x128xf32>
    %35 = arith.addf %32, %34 : vector<8x128xf32>
    %c0_26 = arith.constant 0 : index
    %c0_27 = arith.constant 0 : index
    %36 = vector.load %arg10[%c0_26, %c0_27] : memref<8x128xf32, #tpu.memory_space<vmem>>, vector<8x128xf32>
    tpu.vector_store %arg10[%c0_26, %c0_27], %35 {strides = array<i32>} : memref<8x128xf32, #tpu.memory_space<vmem>>, vector<8x128xf32>,
    %37 = tpu.iota {dimensions = array<i32: 0>} : vector<8x128xi32>
    %c8_i32 = arith.constant 8 : i32
    %38 = arith.muli %arg0, %c8_i32 : i32
    %39 = vector.broadcast %38 : i32 to vector<8x128xi32>
    %40 = arith.addi %37, %39 : vector<8x128xi32>
    %41 = tpu.iota {dimensions = array<i32: 1>} : vector<8x128xi32>
    %c2_i32 = arith.constant 2 : i32
    %42 = vector.broadcast %c2_i32 : i32 to vector<8x128xi32>
    %43 = arith.cmpi slt, %40, %42 : vector<8x128xi32>
    %c65_i32 = arith.constant 65 : i32
    %44 = vector.broadcast %c65_i32 : i32 to vector<8x128xi32>
    %45 = arith.cmpi slt, %41, %44 : vector<8x128xi32>
    %46 = arith.andi %43, %45 : vector<8x128xi1>
    %cst_28 = arith.constant 0.000000e+00 : f32
    %47 = vector.broadcast %cst_28 : f32 to vector<8x128xf32>
    %48 = arith.select %46, %35, %47 : vector<8x128xi1>, vector<8x128xf32>
    %49 = vector.shape_cast %48 : vector<8x128xf32> to vector<1x8x128xf32>
    %cst_29 = arith.constant dense<0.000000e+00> : vector<1xf32>
    %50 = vector.multi_reduction <add>, %49, %cst_29 [1, 2] : vector<1x8x128xf32> to vector<1xf32>
    %51 = vector.shape_cast %50 : vector<1xf32> to vector<1x1x1xf32>
    %52 = vector.extract %51[0, 0, 0] : f32 from vector<1x1x1xf32>
    %53 = vector.broadcast %52 : f32 to vector<8x128xf32>
    %c0_30 = arith.constant 0 : index
    %c0_31 = arith.constant 0 : index
    %54 = vector.load %arg11[%c0_30, %c0_31] : memref<8x128xf32, #tpu.memory_space<vmem>>, vector<8x128xf32>
    tpu.vector_store %arg11[%c0_30, %c0_31], %53 {strides = array<i32>} : memref<8x128xf32, #tpu.memory_space<vmem>>, vector<8x128xf32>,
    return
  }
  func.func @transform_0(%arg0: i32) -> (i32, i32) {
    %c0_i32 = arith.constant 0 : i32
    %c0_i32_0 = arith.constant 0 : i32
    return %arg0, %c0_i32 : i32, i32
  }
  func.func @transform_1(%arg0: i32) -> (i32, i32) {
    %c0_i32 = arith.constant 0 : i32
    %c0_i32_0 = arith.constant 0 : i32
    %c0_i32_1 = arith.constant 0 : i32
    return %c0_i32, %c0_i32_0 : i32, i32
  }
  func.func @transform_2(%arg0: i32) -> (i32, i32) {
    %c0_i32 = arith.constant 0 : i32
    %c0_i32_0 = arith.constant 0 : i32
    %c0_i32_1 = arith.constant 0 : i32
    return %c0_i32, %c0_i32_0 : i32, i32
  }
  func.func @transform_3(%arg0: i32) -> (i32, i32) {
    %c0_i32 = arith.constant 0 : i32
    %c0_i32_0 = arith.constant 0 : i32
    %c0_i32_1 = arith.constant 0 : i32
    return %c0_i32, %c0_i32_0 : i32, i32
  }
  func.func @transform_4(%arg0: i32) -> (i32, i32) {
    %c0_i32 = arith.constant 0 : i32
    %c0_i32_0 = arith.constant 0 : i32
    %c0_i32_1 = arith.constant 0 : i32
    return %c0_i32, %c0_i32_0 : i32, i32
  }
  func.func @transform_5(%arg0: i32) -> (i32, i32) {
    %c0_i32 = arith.constant 0 : i32
    %c0_i32_0 = arith.constant 0 : i32
    %c0_i32_1 = arith.constant 0 : i32
    return %c0_i32, %c0_i32_0 : i32, i32
  }
  func.func @transform_6(%arg0: i32) -> (i32, i32) {
    %c0_i32 = arith.constant 0 : i32
    %c0_i32_0 = arith.constant 0 : i32
    %c0_i32_1 = arith.constant 0 : i32
    return %c0_i32, %c0_i32_0 : i32, i32
  }
  func.func @transform_7(%arg0: i32) -> (i32, i32) {
    %c0_i32 = arith.constant 0 : i32
    %c0_i32_0 = arith.constant 0 : i32
    %c0_i32_1 = arith.constant 0 : i32
    return %c0_i32, %c0_i32_0 : i32, i32
  }
  func.func @transform_8(%arg0: i32) -> (i32, i32) {
    %c0_i32 = arith.constant 0 : i32
    %c0_i32_0 = arith.constant 0 : i32
    %c0_i32_1 = arith.constant 0 : i32
    return %c0_i32, %c0_i32_0 : i32, i32
  }
  func.func @transform_9(%arg0: i32) -> (i32, i32) {
    %c0_i32 = arith.constant 0 : i32
    %c0_i32_0 = arith.constant 0 : i32
    return %arg0, %c0_i32 : i32, i32
  }
  func.func @transform_10(%arg0: i32) -> (i32, i32) {
    %c0_i32 = arith.constant 0 : i32
    %c0_i32_0 = arith.constant 0 : i32
    return %arg0, %c0_i32 : i32, i32
  }
}

</mosaic_0001>

<bundles_post_ra>
// kernel: tpu_custom_call.1
= control target key start
LH: loop header
LB: loop body
LE: loop exit
PB: predicated region body
PF: predicated region fallthrough
CT: control target
= control target key end

     0   :  { %16 = vsyncpa [#allocation3], 0  ;;  %s998_s0 = inlined_call_operand.hbm [shape: f32[8,64], index: 0, kind: input, shape index: {}]   ;;  %s999_s1 = inlined_call_operand.hbm [shape: f32[64,128], index: 1, kind: input, shape index: {}]   ;;  %s1000_s2 = inlined_call_operand.vmem [shape: f32[1,128], index: 2, kind: input, shape index: {}]   ;;  %s1001_s3 = inlined_call_operand.hbm [shape: f32[128,256], index: 3, kind: input, shape index: {}]   ;;  %s1002_s4 = inlined_call_operand.vmem [shape: f32[1,256], index: 4, kind: input, shape index: {}]   ;;  %s1003_s5 = inlined_call_operand.hbm [shape: f32[256,128], index: 5, kind: input, shape index: {}]   ;;  %s1004_s6 = inlined_call_operand.vmem [shape: f32[1,128], index: 6, kind: input, shape index: {}]   ;;  %s1005_s7 = inlined_call_operand.hbm [shape: f32[128,128], index: 7, kind: input, shape index: {}]   ;;  %s1006_s8 = inlined_call_operand.vmem [shape: f32[1,128], index: 8, kind: input, shape index: {}]   ;;  %s1007_s9 = inlined_call_operand.hbm [shape: f32[8,128], index: 9, kind: output, shape index: {0}]   ;;  %s1008_s10 = inlined_call_operand.hbm [shape: f32[8,128], index: 10, kind: output, shape index: {1}]  }
   0x1   :  { %17 = vsyncpa [#allocation6], 0 }
   0x2   :  { %18 = vsyncpa [#allocation9], 0 }
   0x3   :  { %19 = vsyncpa [#allocation4], 0 }
   0x4   :  { %20 = vsyncpa [#allocation13], 0  ;;  %s859_s13 = smov [#allocation5]  }
   0x5   :  { %s36_s14 = sshll.u32 %s859_s13, 4  ;;  %s37_s14 = int_to_ptr.vmem [resolvable:$true] %s36_s14 }
   0x6   :  { %s717_s15 = scalar_lea.vmem %s37_s14, 1024  ;;  %p722_p1 = scmp.lt.s32.totalorder %s37_s14, %s37_s14 }
   0x7   :  { %p718_p0 = scmp.ne.s32.totalorder %s37_s14, %s717_s15  ;;  %p723_p2 = scmp.lt.s32.totalorder %s717_s15, %s717_s15 }
   0x9   :  { %p724_p3 = por %p723_p2, %p722_p1 }
   0xb   :  { %p725_p4 = pnand %p724_p3, %p718_p0 }
   0xd   :  { %728 = shalt.err (!%p725_p4)
}
   0xe   :  { %s860_s16 = smov 128   ;;  %s861_s17 = smov 8  }
   0xf   :  { %42 = dma.hbm_to_vmem [thread:$0]  %s999_s1, 1024, %s37_s14, [#allocation6], %s860_s16, %s860_s16, %s861_s17  }
  0x10   :  { %s862_s20 = smov [#allocation8]   ;;  %s863_s22 = smov [#allocation2]  }
  0x11   :  { %s64_s21 = sshll.u32 %s862_s20, 4  ;;  %s27_s23 = sshll.u32 %s863_s22, 4  ;;  %s65_s21 = int_to_ptr.vmem [resolvable:$true] %s64_s21  ;;  %s28_s23 = int_to_ptr.vmem [resolvable:$true] %s27_s23 }
  0x12   :  { %s737_s24 = scalar_lea.vmem %s65_s21, 4096  ;;  %p742_p6 = scmp.lt.s32.totalorder %s65_s21, %s65_s21 }
  0x13   :  { %p738_p5 = scmp.ne.s32.totalorder %s65_s21, %s737_s24  ;;  %p743_p7 = scmp.lt.s32.totalorder %s737_s24, %s737_s24 }
  0x15   :  { %p744_p8 = por %p743_p7, %p742_p6 }
  0x17   :  { %p745_p9 = pnand %p744_p8, %p738_p5 }
  0x19   :  { %748 = shalt.err (!%p745_p9)
}
  0x1a   :  { %70 = dma.hbm_to_vmem [thread:$0]  %s1003_s5, 4096, %s65_s21, [#allocation9], %s860_s16, %s860_s16, %s861_s17  }
  0x1b   :  { %s757_s1 = scalar_lea.vmem %s28_s23, 128  ;;  %p762_p11 = scmp.lt.s32.totalorder %s28_s23, %s28_s23 }
  0x1c   :  { %p758_p10 = scmp.ne.s32.totalorder %s28_s23, %s757_s1  ;;  %p763_p12 = scmp.lt.s32.totalorder %s757_s1, %s757_s1 }
  0x1e   :  { %p764_p13 = por %p763_p12, %p762_p11 }
  0x20   :  { %p765_p0 = pnand %p764_p13, %p758_p10 }
  0x22   :  { %768 = shalt.err (!%p765_p0)
}
  0x23   :  { %30 = dma.hbm_to_vmem [thread:$0]  %s998_s0, 128, %s28_s23, [#allocation3]  }
  0x24   :  { %s864_s29 = smov [#allocation7]  }
  0x25   :  { %s50_s30 = sshll.u32 %s864_s29, 4  ;;  %s51_s30 = int_to_ptr.vmem [resolvable:$true] %s50_s30 }
  0x26   :  { %s777_s11 = scalar_lea.vmem %s51_s30, 4096  ;;  %p782_p2 = scmp.lt.s32.totalorder %s51_s30, %s51_s30 }
  0x27   :  { %p778_p1 = scmp.ne.s32.totalorder %s51_s30, %s777_s11  ;;  %p783_p3 = scmp.lt.s32.totalorder %s777_s11, %s777_s11 }
  0x29   :  { %p784_p4 = por %p783_p3, %p782_p2 }
  0x2b   :  { %p785_p5 = pnand %p784_p4, %p778_p1 }
  0x2d   :  { %788 = shalt.err (!%p785_p5)
}
  0x2e   :  { %s865_s5 = smov 256   ;;  %s866_s12 = smov 16  }
  0x2f   :  { %56 = dma.hbm_to_vmem [thread:$0]  %s1001_s3, 4096, %s51_s30, [#allocation6], %s865_s5, %s865_s5, %s866_s12  }
  0x30   :  { %s867_s15 = smov [#allocation10]  }
  0x31   :  { %s78_s18 = sshll.u32 %s867_s15, 4  ;;  %s79_s18 = int_to_ptr.vmem [resolvable:$true] %s78_s18 }
  0x32   :  { %s797_s0 = scalar_lea.vmem %s79_s18, 2048  ;;  %p802_p7 = scmp.lt.s32.totalorder %s79_s18, %s79_s18 }
  0x33   :  { %p798_p6 = scmp.ne.s32.totalorder %s79_s18, %s797_s0  ;;  %p803_p8 = scmp.lt.s32.totalorder %s797_s0, %s797_s0 }
  0x35   :  { %p804_p9 = por %p803_p8, %p802_p7 }
  0x37   :  { %p805_p10 = pnand %p804_p9, %p798_p6 }
  0x39   :  { %808 = shalt.err (!%p805_p10)
}
  0x3a   :  { %84 = dma.hbm_to_vmem [thread:$0]  %s1005_s7, 2048, %s79_s18, [#allocation9], %s860_s16, %s860_s16, %s861_s17  }
  0x3b   :  { %849 = dma.done.wait [#allocation3], 128  }
  0x3c   :  { %850 = vsyncadd [#allocation3], 4294967168 }
  0x3d   :  { %851 = dma.done.wait [#allocation6], 5120  }
  0x3e   :  { %852 = vsyncadd [#allocation6], 4294962176 }
  0x3f   :  { %853 = dma.done.wait [#allocation9], 6144  }
  0x40   :  { %854 = vsyncadd [#allocation9], 4294961152  ;;  %v868_v0 = vmov 0.0   ;;  %vm869_vm0 = vmmov 0   ;;  %v110_v1 = vld [vmem:[#allocation5 + $0x38] sm:$0xff]  ;;  %v109_v2 = vld [vmem:[#allocation5 + $0x30] sm:$0xff] }
  0x41   :  { %640 = vmatprep.subr.mxu0 %v868_v0  ;;  %656 = vmatprep.mubr.msk.f32.mxu0 %vm869_vm0, %v868_v0  ;;  %v108_v3 = vld [vmem:[#allocation5 + $0x28] sm:$0xff]  ;;  %v226_v4 = vld [vmem:[#allocation7 + $0xf8] sm:$0xff]  ;;  %v225_v5 = vld [vmem:[#allocation7 + $0xf0] sm:$0xff]  ;;  %vm118_vm1 = vcmask 523264  }
  0x42   :  { %303 = vmatprep.mubr.f32.mxu1 %v868_v0  ;;  %641 = vmatpush3.msra.mxu0 %v110_v1  ;;  %v224_v6 = vld [vmem:[#allocation7 + $0xe8] sm:$0xff]  ;;  %v107_v7 = vld [vmem:[#allocation5 + $0x20] sm:$0xff]  ;;  %v222_v9 = vld [vmem:[#allocation7 + $0xd8] sm:$0xff] }
  0x43   :  { %642 = vmatprep.subr.mxu0 %v868_v0  ;;  %239 = vmatprep.subr.mxu1 %v226_v4  ;;  %v223_v8 = vld [vmem:[#allocation7 + $0xe0] sm:$0xff]  ;;  %v106_v10 = vld [vmem:[#allocation5 + $0x18] sm:$0xff]  ;;  %v221_v11 = vld [vmem:[#allocation7 + $0xd0] sm:$0xff] }
  0x44   :  { %643 = vmatpush3.msra.mxu0 %v109_v2  ;;  %240 = vmatpush1.msra.mxu1 %v225_v5  ;;  %v220_v12 = vld [vmem:[#allocation7 + $0xc8] sm:$0xff]  ;;  %v105_v13 = vld [vmem:[#allocation5 + $0x10] sm:$0xff]  ;;  %v219_v14 = vld [vmem:[#allocation7 + $0xc0] sm:$0xff] }
  0x45   :  { %644 = vmatprep.subr.mxu0 %v868_v0  ;;  %241 = vmatprep.subr.mxu1 %v224_v6  ;;  %v218_v15 = vld [vmem:[#allocation7 + $0xb8] sm:$0xff]  ;;  %v104_v16 = vld [vmem:[#allocation5 + $0x8] sm:$0xff]  ;;  %v217_v17 = vld [vmem:[#allocation7 + $0xb0] sm:$0xff] }
  0x46   :  { %645 = vmatpush3.msra.mxu0 %v108_v3  ;;  %242 = vmatpush1.msra.mxu1 %v223_v8  ;;  %v216_v18 = vld [vmem:[#allocation7 + $0xa8] sm:$0xff]  ;;  %v103_v19 = vld [vmem:[#allocation5] sm:$0xff]  ;;  %v102_v21 = vld [vmem:[#allocation2] sm:$0xff] }
  0x47   :  { %646 = vmatprep.subr.mxu0 %v868_v0  ;;  %243 = vmatprep.subr.mxu1 %v222_v9  ;;  %v215_v20 = vld [vmem:[#allocation7 + $0xa0] sm:$0xff]  ;;  %v214_v22 = vld [vmem:[#allocation7 + $0x98] sm:$0xff]  ;;  %v213_v23 = vld [vmem:[#allocation7 + $0x90] sm:$0xff] }
  0x48   :  { %647 = vmatpush3.msra.mxu0 %v107_v7  ;;  %244 = vmatpush1.msra.mxu1 %v221_v11  ;;  %v212_v24 = vld [vmem:[#allocation7 + $0x88] sm:$0xff]  ;;  %v211_v25 = vld [vmem:[#allocation7 + $0x80] sm:$0xff]  ;;  %v210_v26 = vld [vmem:[#allocation7 + $0x78] sm:$0xff] }
  0x49   :  { %648 = vmatprep.subr.mxu0 %v868_v0  ;;  %245 = vmatprep.subr.mxu1 %v220_v12  ;;  %v209_v27 = vld [vmem:[#allocation7 + $0x70] sm:$0xff]  ;;  %v208_v28 = vld [vmem:[#allocation7 + $0x68] sm:$0xff]  ;;  %v207_v29 = vld [vmem:[#allocation7 + $0x60] sm:$0xff] }
  0x4a   :  { %649 = vmatpush3.msra.mxu0 %v106_v10  ;;  %246 = vmatpush1.msra.mxu1 %v219_v14  ;;  %v206_v30 = vld [vmem:[#allocation7 + $0x58] sm:$0xff]  ;;  %v205_v31 = vld [vmem:[#allocation7 + $0x50] sm:$0xff]  ;;  %v204_v32 = vld [vmem:[#allocation7 + $0x48] sm:$0xff] }
  0x4b   :  { %650 = vmatprep.subr.mxu0 %v868_v0  ;;  %247 = vmatprep.subr.mxu1 %v218_v15  ;;  %v203_v33 = vld [vmem:[#allocation7 + $0x40] sm:$0xff]  ;;  %v202_v34 = vld [vmem:[#allocation7 + $0x38] sm:$0xff]  ;;  %v201_v35 = vld [vmem:[#allocation7 + $0x30] sm:$0xff] }
  0x4c   :  { %651 = vmatpush3.msra.mxu0 %v105_v13  ;;  %248 = vmatpush1.msra.mxu1 %v217_v17  ;;  %v200_v36 = vld [vmem:[#allocation7 + $0x28] sm:$0xff]  ;;  %v199_v37 = vld [vmem:[#allocation7 + $0x20] sm:$0xff]  ;;  %v198_v38 = vld [vmem:[#allocation7 + $0x18] sm:$0xff] }
  0x4d   :  { %652 = vmatprep.subr.mxu0 %v868_v0  ;;  %249 = vmatprep.subr.mxu1 %v216_v18  ;;  %v197_v39 = vld [vmem:[#allocation7 + $0x10] sm:$0xff]  ;;  %v196_v40 = vld [vmem:[#allocation7 + $0x8] sm:$0xff]  ;;  %v195_v41 = vld [vmem:[#allocation7] sm:$0xff] }
  0x4e   :  { %653 = vmatpush3.msra.mxu0 %v104_v16  ;;  %250 = vmatpush1.msra.mxu1 %v215_v20  ;;  %v347_v42 = vld [vmem:[#allocation8 + $0xf8] sm:$0xff]  ;;  %v346_v44 = vld [vmem:[#allocation8 + $0xf0] sm:$0xff]  ;;  %v345_v46 = vld [vmem:[#allocation8 + $0xe8] sm:$0xff] }
  0x4f   :  { %654 = vmatprep.subr.mxu0 %v868_v0  ;;  %251 = vmatprep.subr.mxu1 %v214_v22  ;;  %v331_v43 = vld [vmem:[#allocation8 + $0x78] sm:$0xff]  ;;  %v330_v45 = vld [vmem:[#allocation8 + $0x70] sm:$0xff]  ;;  %v329_v47 = vld [vmem:[#allocation8 + $0x68] sm:$0xff] }
  0x50   :  { %655 = vmatpush3.msra.mxu0 %v103_v19  ;;  %252 = vmatpush1.msra.mxu1 %v213_v23  ;;  %v344_v48 = vld [vmem:[#allocation8 + $0xe0] sm:$0xff]  ;;  %v343_v50 = vld [vmem:[#allocation8 + $0xd8] sm:$0xff]  ;;  %v342_v52 = vld [vmem:[#allocation8 + $0xd0] sm:$0xff] }
  0x51   :  { %657 = vmatmul.mubr.msk.f32.vlgmr.msra.gmra.mxu0 %vm118_vm1, %v102_v21  ;;  %253 = vmatprep.subr.mxu1 %v212_v24  ;;  %v328_v49 = vld [vmem:[#allocation8 + $0x60] sm:$0xff]  ;;  %v327_v51 = vld [vmem:[#allocation8 + $0x58] sm:$0xff]  ;;  %v326_v53 = vld [vmem:[#allocation8 + $0x50] sm:$0xff] }
  0x52   :  { %254 = vmatpush1.msra.mxu1 %v211_v25  ;;  %588 = vmatprep.subr.mxu0 %v347_v42  ;;  %v341_v54 = vld [vmem:[#allocation8 + $0xc8] sm:$0xff]  ;;  %v340_v56 = vld [vmem:[#allocation8 + $0xc0] sm:$0xff]  ;;  %v339_v58 = vld [vmem:[#allocation8 + $0xb8] sm:$0xff] }
  0x53   :  { %255 = vmatprep.subr.mxu1 %v210_v26  ;;  %589 = vmatpush3.msra.mxu0 %v331_v43  ;;  %v325_v55 = vld [vmem:[#allocation8 + $0x48] sm:$0xff]  ;;  %v324_v57 = vld [vmem:[#allocation8 + $0x40] sm:$0xff]  ;;  %v323_v59 = vld [vmem:[#allocation8 + $0x38] sm:$0xff] }
  0x54   :  { %256 = vmatpush1.msra.mxu1 %v209_v27  ;;  %590 = vmatprep.subr.mxu0 %v346_v44  ;;  %v338_v60 = vld [vmem:[#allocation8 + $0xb0] sm:$0xff]  ;;  %v337_v62 = vld [vmem:[#allocation8 + $0xa8] sm:$0xff]  ;;  %v336_v1 = vld [vmem:[#allocation8 + $0xa0] sm:$0xff] }
  0x55   :  { %257 = vmatprep.subr.mxu1 %v208_v28  ;;  %591 = vmatpush3.msra.mxu0 %v330_v45  ;;  %v322_v61 = vld [vmem:[#allocation8 + $0x30] sm:$0xff]  ;;  %v321_v63 = vld [vmem:[#allocation8 + $0x28] sm:$0xff]  ;;  %v575_v2 = vld [vmem:[%s1000_s2] ss:$0 sm:$0xff]  ;;  %v229_v28 = vlaneseq }
  0x56   :  { %258 = vmatpush1.msra.mxu1 %v207_v29  ;;  %592 = vmatprep.subr.mxu0 %v345_v46  ;;  %v320_v8 = vld [vmem:[#allocation8 + $0x20] sm:$0xff]  ;;  %v335_v9 = vld [vmem:[#allocation8 + $0x98] sm:$0xff]  ;;  %v334_v11 = vld [vmem:[#allocation8 + $0x90] sm:$0xff] }
  0x57   :  { %259 = vmatprep.subr.mxu1 %v206_v30  ;;  %593 = vmatpush3.msra.mxu0 %v329_v47  ;;  %v319_v10 = vld [vmem:[#allocation8 + $0x18] sm:$0xff]  ;;  %v318_v12 = vld [vmem:[#allocation8 + $0x10] sm:$0xff]  ;;  %v333_v13 = vld [vmem:[#allocation8 + $0x88] sm:$0xff]  ;;  %v230_v29 = vshrl.u32 %v229_v28, 7 }
  0x58   :  { %260 = vmatpush1.msra.mxu1 %v205_v31  ;;  %594 = vmatprep.subr.mxu0 %v344_v48  ;;  %v317_v14 = vld [vmem:[#allocation8 + $0x8] sm:$0xff]  ;;  %v332_v15 = vld [vmem:[#allocation8 + $0x80] sm:$0xff]  ;;  %v443_v17 = vld [vmem:[#allocation10 + $0x78] sm:$0xff] }
  0x59   :  { %261 = vmatprep.subr.mxu1 %v204_v32  ;;  %595 = vmatpush3.msra.mxu0 %v328_v49  ;;  %v316_v16 = vld [vmem:[#allocation8] sm:$0xff]  ;;  %v442_v18 = vld [vmem:[#allocation10 + $0x70] sm:$0xff]  ;;  %v441_v19 = vld [vmem:[#allocation10 + $0x68] sm:$0xff]  ;;  %v231_v30 = vsub.s32 0, %v230_v29  ;;  %v235_v32 = vsub.s32 1, %v230_v29  ;;  %vm529_vm6 = vcmp.lt.s32.totalorder %v230_v29, 2 }
  0x5a   :  { %262 = vmatpush1.msra.mxu1 %v203_v33  ;;  %596 = vmatprep.subr.mxu0 %v343_v50  ;;  %v440_v20 = vld [vmem:[#allocation10 + $0x60] sm:$0xff]  ;;  %v439_v21 = vld [vmem:[#allocation10 + $0x58] sm:$0xff]  ;;  %v438_v22 = vld [vmem:[#allocation10 + $0x50] sm:$0xff] }
  0x5b   :  { %263 = vmatprep.subr.mxu1 %v202_v34  ;;  %597 = vmatpush3.msra.mxu0 %v327_v51  ;;  %v437_v23 = vld [vmem:[#allocation10 + $0x48] sm:$0xff]  ;;  %v436_v24 = vld [vmem:[#allocation10 + $0x40] sm:$0xff]  ;;  %v435_v25 = vld [vmem:[#allocation10 + $0x38] sm:$0xff] }
  0x5c   :  { %264 = vmatpush1.msra.mxu1 %v201_v35  ;;  %598 = vmatprep.subr.mxu0 %v342_v52  ;;  %v434_v26 = vld [vmem:[#allocation10 + $0x30] sm:$0xff]  ;;  %v433_v27 = vld [vmem:[#allocation10 + $0x28] sm:$0xff]  ;;  %v227_v31 = vld [vmem:[%s1002_s4] sm:$0x3] }
  0x5d   :  { %265 = vmatprep.subr.mxu1 %v200_v36  ;;  %599 = vmatpush3.msra.mxu0 %v326_v53  ;;  %v232_v33 = vrot.slane %v227_v31, %v231_v30  ;;  %v236_v34 = vrot.slane %v227_v31, %v235_v32  ;;  %v432_v43 = vld [vmem:[#allocation10 + $0x20] sm:$0xff]  ;;  %v431_v44 = vld [vmem:[#allocation10 + $0x18] sm:$0xff]  ;;  %v430_v45 = vld [vmem:[#allocation10 + $0x10] sm:$0xff] }
  0x5e   :  { %266 = vmatpush1.msra.mxu1 %v199_v37  ;;  %600 = vmatprep.subr.mxu0 %v341_v54  ;;  %v429_v46 = vld [vmem:[#allocation10 + $0x8] sm:$0xff]  ;;  %v428_v47 = vld [vmem:[#allocation10] sm:$0xff]  ;;  %v577_v49 = vld [vmem:[%s1004_s6] ss:$0 sm:$0xff]  ;;  %s870_s6 = smov [#allocation11]  }
  0x5f   :  { %267 = vmatprep.subr.mxu1 %v198_v38  ;;  %601 = vmatpush3.msra.mxu0 %v325_v55  ;;  %v528_v55 = vand.u32 127, %v229_v28  ;;  %s550_s23 = sshll.u32 %s870_s6, 4  ;;  %s551_s23 = int_to_ptr.vmem [resolvable:$true] %s550_s23 }
  0x60   :  { %268 = vmatpush1.msra.mxu1 %v197_v39  ;;  %602 = vmatprep.subr.mxu0 %v340_v56  ;;  %s809_s24 = scalar_lea.vmem %s551_s23, 128  ;;  %p814_p12 = scmp.lt.s32.totalorder %s551_s23, %s551_s23 }
  0x61   :  { %269 = vmatprep.subr.mxu1 %v196_v40  ;;  %603 = vmatpush3.msra.mxu0 %v324_v57  ;;  %vm530_vm7 = vcmp.lt.s32.totalorder %v528_v55, 65  ;;  %p810_p11 = scmp.ne.s32.totalorder %s551_s23, %s809_s24  ;;  %p815_p13 = scmp.lt.s32.totalorder %s809_s24, %s809_s24 }
  0x62   :  { %270 = vmatpush1.msra.mxu1 %v195_v41  ;;  %604 = vmatprep.subr.mxu0 %v339_v58  ;;  %vm531_vm8 = vmand %vm529_vm6, %vm530_vm7 }
  0x63   :  { %659 = vmatprep.subr.mxu1 %v868_v0  ;;  %605 = vmatpush3.msra.mxu0 %v323_v59  ;;  %p816_p0 = por %p815_p13, %p814_p12 }
  0x64   :  { %606 = vmatprep.subr.mxu0 %v338_v60 }
  0x65   :  { %607 = vmatpush3.msra.mxu0 %v322_v61  ;;  %p817_p1 = pnand %p816_p0, %p810_p11 }
  0x66   :  { %608 = vmatprep.subr.mxu0 %v337_v62 }
  0x67   :  { %609 = vmatpush3.msra.mxu0 %v321_v63 }
  0x68   :  { %610 = vmatprep.subr.mxu0 %v336_v1 }
  0x69   :  { %611 = vmatpush3.msra.mxu0 %v320_v8 }
  0x6a   :  { %612 = vmatprep.subr.mxu0 %v335_v9 }
  0x6b   :  { %613 = vmatpush3.msra.mxu0 %v319_v10 }
  0x6c   :  { %614 = vmatprep.subr.mxu0 %v334_v11 }
  0x6d   :  { %615 = vmatpush3.msra.mxu0 %v318_v12 }
  0x6e   :  { %616 = vmatprep.subr.mxu0 %v333_v13 }
  0x6f   :  { %617 = vmatpush3.msra.mxu0 %v317_v14 }
  0x70   :  { %618 = vmatprep.subr.mxu0 %v332_v15 }
  0x71   :  { %619 = vmatpush3.msra.mxu0 %v316_v16 }
 0x111   :  { %v188_v3 = vpop.f32.mrf.mxu0 }
 0x112   :  { %v189_v4 = vadd.f32 %v575_v2, %v188_v3 }
 0x113   :  { %v658_v5 = vpop.f32.mrf.mxu0 }
 0x114   :  { %v193_v6 = vmul.f32 0.01, %v189_v4  ;;  %vm192_vm2 = vcmp.gt.f32.partialorder %v189_v4, 0.0 }
 0x116   :  { %v194_v7 = vsel %vm192_vm2, %v189_v4, %v193_v6 }
 0x117   :  { %304 = vmatmul.mubr.f32.vlgmr.msra.gmra.mxu1 %v194_v7 }
 0x118   :  { %691 = vmatprep.mubr.msk.f32.mxu1 %vm869_vm0, %v868_v0  ;;  %660 = vmatpush3.msra.mxu1 %v443_v17 }
 0x119   :  { %661 = vmatprep.subr.mxu1 %v868_v0 }
 0x11a   :  { %662 = vmatpush3.msra.mxu1 %v442_v18 }
 0x11b   :  { %663 = vmatprep.subr.mxu1 %v868_v0 }
 0x11c   :  { %664 = vmatpush3.msra.mxu1 %v441_v19 }
 0x11d   :  { %665 = vmatprep.subr.mxu1 %v868_v0 }
 0x11e   :  { %666 = vmatpush3.msra.mxu1 %v440_v20 }
 0x11f   :  { %667 = vmatprep.subr.mxu1 %v868_v0 }
 0x120   :  { %668 = vmatpush3.msra.mxu1 %v439_v21 }
 0x121   :  { %669 = vmatprep.subr.mxu1 %v868_v0 }
 0x122   :  { %670 = vmatpush3.msra.mxu1 %v438_v22 }
 0x123   :  { %671 = vmatprep.subr.mxu1 %v868_v0 }
 0x124   :  { %672 = vmatpush3.msra.mxu1 %v437_v23 }
 0x125   :  { %673 = vmatprep.subr.mxu1 %v868_v0 }
 0x126   :  { %674 = vmatpush3.msra.mxu1 %v436_v24 }
 0x127   :  { %675 = vmatprep.subr.mxu1 %v868_v0 }
 0x128   :  { %676 = vmatpush3.msra.mxu1 %v435_v25 }
 0x129   :  { %677 = vmatprep.subr.mxu1 %v868_v0 }
 0x12a   :  { %678 = vmatpush3.msra.mxu1 %v434_v26 }
 0x12b   :  { %679 = vmatprep.subr.mxu1 %v868_v0 }
 0x12c   :  { %680 = vmatpush3.msra.mxu1 %v433_v27 }
 0x12d   :  { %681 = vmatprep.subr.mxu1 %v868_v0 }
 0x12e   :  { %682 = vmatpush3.msra.mxu1 %v432_v43 }
 0x12f   :  { %683 = vmatprep.subr.mxu1 %v868_v0 }
 0x130   :  { %684 = vmatpush3.msra.mxu1 %v431_v44 }
 0x131   :  { %685 = vmatprep.subr.mxu1 %v868_v0 }
 0x132   :  { %686 = vmatpush3.msra.mxu1 %v430_v45 }
 0x133   :  { %687 = vmatprep.subr.mxu1 %v868_v0 }
 0x134   :  { %688 = vmatpush3.msra.mxu1 %v429_v46 }
 0x135   :  { %689 = vmatprep.subr.mxu1 %v868_v0  ;;  %v578_v0 = vld [vmem:[%s1006_s8] ss:$0 sm:$0xff] }
 0x136   :  { %690 = vmatpush3.msra.mxu1 %v428_v47 }
 0x1d7   :  { %v305_v35 = vpop.f32.mrf.mxu1 }
 0x1d8   :  { %v306_v36 = vadd.f32 %v305_v35, %v232_v33 }
 0x1d9   :  { %v307_v37 = vpop.f32.mrf.mxu1 }
 0x1da   :  { %v308_v38 = vadd.f32 %v307_v37, %v236_v34  ;;  %v312_v39 = vmul.f32 0.01, %v306_v36  ;;  %vm310_vm3 = vcmp.gt.f32.partialorder %v306_v36, 0.0 }
 0x1dc   :  { %v313_v40 = vmul.f32 0.01, %v308_v38  ;;  %vm311_vm4 = vcmp.gt.f32.partialorder %v308_v38, 0.0  ;;  %v314_v42 = vsel %vm310_vm3, %v306_v36, %v312_v39 }
 0x1de   :  { %v315_v41 = vsel %vm311_vm4, %v308_v38, %v313_v40 }
 0x1df   :  { %419 = vmatprep.mubr.f32.mxu0 %v315_v41 }
 0x1e0   :  { %420 = vmatmul.mubr.f32.vlgmr.msra.gmra.mxu0 %v314_v42 }
 0x2a0   :  { %v620_v48 = vpop.f32.mrf.mxu0 }
 0x2a2   :  { %v621_v50 = vpop.f32.mrf.mxu0 }
 0x2a3   :  { %v622_v51 = vadd.f32 %v621_v50, %v620_v48 }
 0x2a5   :  { %v422_v52 = vadd.f32 %v622_v51, %v577_v49 }
 0x2a7   :  { %v426_v53 = vmul.f32 0.01, %v422_v52  ;;  %vm425_vm5 = vcmp.gt.f32.partialorder %v422_v52, 0.0 }
 0x2a9   :  { %v427_v54 = vsel %vm425_vm5, %v422_v52, %v426_v53 }
 0x2aa   :  { %692 = vmatmul.mubr.f32.vlgmr.msra.gmra.mxu1 %v427_v54 }
 0x36a   :  { %v517_v56 = vpop.f32.mrf.mxu1 }
 0x36b   :  { %v518_v57 = vadd.f32 %v578_v0, %v517_v56 }
 0x36c   :  { %v693_v58 = vpop.f32.mrf.mxu1 }
 0x36d   :  { %521 = vst [vmem:[#allocation11] sm:$0xff] %v518_v57  ;;  %v532_v59 = vsel %vm531_vm8, %v518_v57, 0.0 }
 0x36e   :  { %533 = vadd.xlane.f32.xlu0 %v532_v59 }
 0x36f   :  { %820 = shalt.err (!%p817_p1)
}
 0x370   :  { %553 = dma.vmem_to_hbm [thread:$0]  %s551_s23, 128, %s1007_s9, [#allocation4]  }
 0x371   :  { %s871_s8 = smov [#allocation12]  }
 0x372   :  { %s560_s1 = sshll.u32 %s871_s8, 4  ;;  %s561_s1 = int_to_ptr.vmem [resolvable:$true] %s560_s1 }
 0x373   :  { %s829_s28 = scalar_lea.vmem %s561_s1, 128  ;;  %p834_p3 = scmp.lt.s32.totalorder %s561_s1, %s561_s1 }
 0x374   :  { %p830_p2 = scmp.ne.s32.totalorder %s561_s1, %s829_s28  ;;  %p835_p4 = scmp.lt.s32.totalorder %s829_s28, %s829_s28 }
 0x376   :  { %p836_p5 = por %p835_p4, %p834_p3 }
 0x378   :  { %p837_p6 = pnand %p836_p5, %p830_p2 }
 0x3f7   :  { %v534_v60 = vpop.xlane.xlu0 %533 }
 0x3f8   :  { %v535_v61 = vrot.slane %v534_v60, 4 }
 0x3fa   :  { %v536_v62 = vadd.f32 %v535_v61, %v534_v60 }
 0x3fc   :  { %v537_v63 = vrot.slane %v536_v62, 2 }
 0x3fe   :  { %v538_v1 = vadd.f32 %v537_v63, %v536_v62 }
 0x400   :  { %v539_v2 = vrot.slane %v538_v1, 1 }
 0x402   :  { %v540_v3 = vadd.f32 %v539_v2, %v538_v1 }
 0x404   :  { %694 = vpush %v540_v3 }
 0x435   :  { %s695_s27 = spop %694 }
 0x436   :  { %v542_v4 = vstv %s695_s27 }
 0x437   :  { %543 = vst [vmem:[#allocation12] sm:$0xff] %v542_v4 }
 0x438   :  { %840 = shalt.err (!%p837_p6)
}
 0x439   :  { %563 = dma.vmem_to_hbm [thread:$0]  %s561_s1, 128, %s1008_s10, [#allocation13]  }
 0x43a   :  { %855 = dma.done.wait [#allocation4], 128  }
 0x43b   :  { %856 = vsyncadd [#allocation4], 4294967168 }
 0x43c   :  { %857 = dma.done.wait [#allocation13], 128  }
 0x43d   :  { %858 = vsyncadd [#allocation13], 4294967168 }
 0x43e   :  { %570 = vsyncpa [#allocation3], 1 }
 0x43f   :  { %571 = vsyncpa [#allocation6], 1 }
 0x440   :  { %572 = vsyncpa [#allocation9], 1 }
 0x441   :  { %573 = vsyncpa [#allocation4], 1 }
 0x442   :  { %574 = vsyncpa [#allocation13], 1 }

</bundles_post_ra>
